<compile_context>
chip_gen: v5e
topology: v5e:2x2
jax: 0.10.0
libtpu: 0.0.40
codegen_flags: <defaults>
</compile_context>

<pallas_src>
import jax
import jax.numpy as jnp
from jax.experimental import pallas as pl
from jax.experimental.pallas import tpu as pltpu


# ----------------------------------------------------------------------------
# Pallas kernel: lane-dense conv matmul  (Cout, K) @ (K, TM) -> (Cout, TM)
# ----------------------------------------------------------------------------
def _conv_matmul_kernel(w_ref, p_ref, o_ref):
    # w_ref: (Cout, K) bf16 resident weight; p_ref: (K, TM) bf16 patch tile;
    # o_ref: (Cout, TM) f32 — TM is a multiple of 128 => unmasked lane stores.
    o_ref[...] = jnp.dot(
        w_ref[...], p_ref[...], preferred_element_type=jnp.float32
    ).astype(o_ref.dtype)


def _tile_vmem_bytes(tm, k, cout):
    # Double-buffered bf16 patch tile + double-buffered f32 output tile
    # + resident bf16 weight.
    return 2 * (k * tm * 2) + 2 * (cout * tm * 4) + cout * k * 2


def _pick_lane_tile(total_lanes, k, cout, vmem_budget_bytes=24 << 20):
    """Largest lane tile that fits the (v7x-safe) VMEM budget and still leaves
    >= 2 grid blocks so both v7x TensorCores get work; falls back to the
    smallest fitting tile (least lane padding) when the whole problem is one
    block anyway."""
    candidates = [
        t
        for t in (2048, 1024, 512, 256, 128)
        if _tile_vmem_bytes(t, k, cout) <= vmem_budget_bytes
    ]
    if not candidates:
        return 128
    multi = [t for t in candidates if pl.cdiv(max(total_lanes, 1), t) >= 2]
    if multi:
        return multi[0]
    return candidates[-1]


# ----------------------------------------------------------------------------
# BasicConv forward: bf16 im2col glue (layout plumbing) + Pallas matmul
# ----------------------------------------------------------------------------
def basic_conv_forward(x, weight, *, pad, stride):
    """x: (N, Cin, H, W) f32; weight: (Cout, Cin, KH, KW) f32 -> (N, Cout, OH, OW) f32."""
    n, cin, h, w = x.shape
    cout, _, kh, kw = weight.shape
    oh = (h + 2 * pad - kh) // stride + 1
    ow = (w + 2 * pad - kw) // stride + 1
    k = cin * kh * kw
    m = oh * ow
    lanes = n * m  # batch folded into the lane axis

    # --- glue: bf16 FIRST, then pad / shift / stack (halves glue HBM bytes) ---
    xb = x.astype(jnp.bfloat16)
    xp = jnp.pad(xb, ((0, 0), (0, 0), (pad, pad), (pad, pad)))
    # Cheap transpose of the un-amplified input so the stacked patches land
    # directly in the batch-folded (K, N*M) layout (no big post-stack transpose).
    xp = jnp.transpose(xp, (1, 0, 2, 3))  # (Cin, N, Hp, Wp)
    slices = [
        xp[:, :, i : i + stride * oh : stride, j : j + stride * ow : stride]
        for i in range(kh)
        for j in range(kw)
    ]
    patches = jnp.stack(slices, axis=1)  # (Cin, KH*KW, N, OH, OW) — matches weight flatten
    patches = patches.reshape(k, lanes)  # (K, N*M) contiguous merge

    w_mat = weight.reshape(cout, k).astype(jnp.bfloat16)  # (Cout, K) resident

    # --- tiling: pick tile first, then pad lanes up to a multiple of it ---
    tm = _pick_lane_tile(lanes, k, cout)
    lanes_padded = pl.cdiv(lanes, tm) * tm
    if lanes_padded != lanes:
        patches = jnp.pad(patches, ((0, 0), (0, lanes_padded - lanes)))
    grid = (lanes_padded // tm,)

    # Explicit VMEM accounting -> scoped limit (v7x: 32 MiB scoped / 64 MiB phys).
    vmem_need = _tile_vmem_bytes(tm, k, cout)
    vmem_limit = int(min(max(2 * vmem_need + (4 << 20), 16 << 20), 32 << 20))

    out = pl.pallas_call(
        _conv_matmul_kernel,
        out_shape=jax.ShapeDtypeStruct((cout, lanes_padded), jnp.float32),
        grid_spec=pltpu.PrefetchScalarGridSpec(
            num_scalar_prefetch=0,
            grid=grid,
            in_specs=[
                # Tiny weight, resident across the whole grid.
                pl.BlockSpec((cout, k), lambda t: (0, 0)),
                # Patch tile: K on sublanes, TM (multiple of 128) on lanes.
                pl.BlockSpec((k, tm), lambda t: (0, t)),
            ],
            # Output tile (Cout, TM): lane-dense, unmasked vector stores.
            out_specs=pl.BlockSpec((cout, tm), lambda t: (0, t)),
        ),
        compiler_params=pltpu.CompilerParams(
            # Single flat lane-tile axis, independent blocks -> shard across
            # megacore / v7x's 2 TensorCores (>=2 blocks whenever lanes >= 256).
            dimension_semantics=("parallel",),
            vmem_limit_bytes=vmem_limit,
        ),
    )(w_mat, patches)

    if lanes_padded != lanes:
        out = out[:, :lanes]
    out = out.reshape(cout, n, oh, ow)
    return jnp.transpose(out, (1, 0, 2, 3))  # (N, Cout, OH, OW)


# ----------------------------------------------------------------------------
# Parameter init: kaiming_normal_(mode='fan_out') (gain=sqrt(2), fan_out=Cout*K*K)
# ----------------------------------------------------------------------------
def make_conv_weight(key, nin, nout, nker):
    fan_out = nout * nker * nker
    std = (2.0 / fan_out) ** 0.5
    return jax.random.normal(key, (nout, nin, nker, nker), dtype=jnp.float32) * std


if __name__ == "__main__":
    # BasicConv(nin=4, nout=8, nker=3, pad=1, stride=1, bias=False)
    nin, nout, nker, pad, stride = 4, 8, 3, 1, 1
    batch, hw = 2, 16

    key = jax.random.PRNGKey(0)
    kx, kw_key = jax.random.split(key)
    x = jax.random.normal(kx, (batch, nin, hw, hw), dtype=jnp.float32)
    weight = make_conv_weight(kw_key, nin, nout, nker)

    y = jax.block_until_ready(basic_conv_forward(x, weight, pad=pad, stride=stride))
    assert y.shape == (batch, nout, hw, hw)

    # Tight check: XLA conv with the same bf16 operands / f32 accumulate.
    y_ref_bf16 = jax.lax.conv_general_dilated(
        x.astype(jnp.bfloat16), weight.astype(jnp.bfloat16),
        window_strides=(stride, stride),
        padding=((pad, pad), (pad, pad)),
        dimension_numbers=("NCHW", "OIHW", "NCHW"),
        preferred_element_type=jnp.float32,
    )
    assert jnp.allclose(y, y_ref_bf16, rtol=1e-2, atol=1e-2)

    # Loose semantic check against the full-f32 reference conv
    # (kernel uses bf16 MXU operands, f32 accumulation).
    y_ref_f32 = jax.lax.conv_general_dilated(
        x, weight,
        window_strides=(stride, stride),
        padding=((pad, pad), (pad, pad)),
        dimension_numbers=("NCHW", "OIHW", "NCHW"),
    )
    assert jnp.allclose(y, y_ref_f32, rtol=5e-2, atol=5e-2)

    print("KERNEL_OK")
</pallas_src>

<mosaic_0001>
module attributes {stable_mosaic.version = 11 : i64} {
  func.func @_conv_matmul_kernel(%arg0: i32, %arg1: memref<8x36xbf16, #tpu.memory_space<vmem>>, %arg2: memref<36x256xbf16, #tpu.memory_space<vmem>>, %arg3: memref<8x256xf32, #tpu.memory_space<vmem>>) attributes {dimension_semantics = [#tpu.dimension_semantics<parallel>], iteration_bounds = array<i64: 2>, scalar_prefetch = 0 : i64, scratch_operands = 0 : i64, tpu.core_type = #tpu.core_type<tc>, window_params = [{pipeline_mode = #tpu.pipeline_mode<synchronous>, transform_indices = @transform_0, window_bounds = array<i64: 8, 36>}, {transform_indices = @transform_1, window_bounds = array<i64: 36, 256>}, {transform_indices = @transform_2, window_bounds = array<i64: 8, 256>}]} {
    %c0 = arith.constant 0 : index
    %c0_0 = arith.constant 0 : index
    %0 = vector.load %arg1[%c0, %c0_0] : memref<8x36xbf16, #tpu.memory_space<vmem>>, vector<8x36xbf16>
    %c0_1 = arith.constant 0 : index
    %c0_2 = arith.constant 0 : index
    %1 = vector.load %arg2[%c0_1, %c0_2] : memref<36x256xbf16, #tpu.memory_space<vmem>>, vector<36x256xbf16>
    %cst = arith.constant dense<0.000000e+00> : vector<8x256xf32>
    %2 = tpu.matmul %0, %1, %cst {dimension_numbers = #tpu.dot_dimension_numbers<[1], [0], [0], [1], [0, 0, 1, 1], [], []>} : vector<8x36xbf16>, vector<36x256xbf16>, vector<8x256xf32> -> vector<8x256xf32>
    %c0_3 = arith.constant 0 : index
    %c0_4 = arith.constant 0 : index
    %3 = vector.load %arg3[%c0_3, %c0_4] : memref<8x256xf32, #tpu.memory_space<vmem>>, vector<8x256xf32>
    tpu.vector_store %arg3[%c0_3, %c0_4], %2 {strides = array<i32>} : memref<8x256xf32, #tpu.memory_space<vmem>>, vector<8x256xf32>,
    return
  }
  func.func @transform_0(%arg0: i32) -> (i32, i32) {
    %c0_i32 = arith.constant 0 : i32
    %c0_i32_0 = arith.constant 0 : i32
    %c0_i32_1 = arith.constant 0 : i32
    return %c0_i32, %c0_i32_0 : i32, i32
  }
  func.func @transform_1(%arg0: i32) -> (i32, i32) {
    %c0_i32 = arith.constant 0 : i32
    %c0_i32_0 = arith.constant 0 : i32
    return %c0_i32, %arg0 : i32, i32
  }
  func.func @transform_2(%arg0: i32) -> (i32, i32) {
    %c0_i32 = arith.constant 0 : i32
    %c0_i32_0 = arith.constant 0 : i32
    return %c0_i32, %arg0 : i32, i32
  }
}

</mosaic_0001>

<bundles_post_ra>
// kernel: tpu_custom_call.1
= control target key start
LH: loop header
LB: loop body
LE: loop exit
PB: predicated region body
PF: predicated region fallthrough
CT: control target
= control target key end

     0   :  { %7 = vsyncpa [#allocation3], 0  ;;  %s745_s0 = inlined_call_operand.hbm [shape: bf16[8,36], index: 0, kind: input, shape index: {}]   ;;  %s746_s1 = inlined_call_operand.hbm [shape: bf16[36,512], index: 1, kind: input, shape index: {}]   ;;  %s747_s2 = inlined_call_operand.hbm [shape: f32[8,512], index: 2, kind: output, shape index: {}]  }
   0x1   :  { %8 = vsyncpa [#allocation6], 0 }
   0x2   :  { %10 = vsyncpa [#allocation6 + $0x1], 0 }
   0x3   :  { %11 = vsyncpa [#allocation4], 0 }
   0x4   :  { %13 = vsyncpa [#allocation4 + $0x1], 0  ;;  %s602_s9 = smov 0   ;;  %s604_s10 = smov 0  }
   0x5   :  { %s606_s11 = smov 0   ;;  %s608_s12 = smov 0  }
   0x6 LB: > { %s623_s13 = sadd.s32 4294967295, %s581_s12   ;;  %s351_s14 = sadd.s32 4294967294, %s581_s12   ;;  %s581_s12 = sphi %s608_s12, %s758_s12   ;;  %s577_s11 = sphi %s606_s11, %s757_s11   ;;  %s573_s10 = sphi %s604_s10, %s756_s10   ;;  %s569_s9 = sphi %s602_s9, %s755_s9  }
   0x7   : > { %s627_s15 = sadd.s32 1, %s581_s12   ;;  %s47_s16 = sadd.s32 1, %s577_s11 }
   0x8   : > { %s44_s17 = ssub.s32 %s581_s12, %s627_s15  ;;  %p54_p0 = scmp.ne.s32.totalorder %s577_s11, %s573_s10 }
   0x9   : > { %p45_p1 = scmp.eq.s32.totalorder %s44_s17, 0  ;;  %p55_p2 = scmp.eq.s32.totalorder %s581_s12, 0 }
   0xa   : > { %p60_p3 = scmp.ne.s32.totalorder %s573_s10, %s569_s9  ;;  %p61_p4 = scmp.eq.s32.totalorder %s623_s13, 0 }
   0xb   : > { %s639_s18 = scalar_select %p45_p1, %s577_s11, %s47_s16  }
   0xc   : > { %p641_p5 = por %p55_p2, %p54_p0  ;;  %p647_p6 = por %p61_p4, %p60_p3 }
   0xd   : > { %p84_p7 = scmp.eq.s32.totalorder %s623_s13, 1  ;;  %p90_p8 = scmp.eq.s32.totalorder %s351_s14, 1 }
   0xe   : > { %p352_p9 = scmp.ge.s32.totalorder %s581_s12, 1  ;;  %p97_p10 = scmp.lt.s32.totalorder %s581_s12, 3 }
   0xf   : > { %p654_p11 = por %p84_p7, %p54_p0  ;;  %p658_p12 = por %p90_p8, %p60_p3 }
  0x10   : > { %p662_p13 = pnand %p352_p9, %p97_p10  ;;  %s109_s26 = sshll.u32 %s745_s0, 4  ;;  %s110_s26 = int_to_ptr.hbm [resolvable:$true] %s109_s26 }
  0x11   : > { %s583_s27 = smov [#allocation2]   ;;  %p412_p3 = scmp.lt.s32.totalorder %s581_s12, 2 }
  0x12   : > { %p399_p1 = pneg %p662_p13  ;;  %s111_s28 = sshll.u32 %s583_s27, 4  ;;  %s112_s28 = int_to_ptr.vmem [resolvable:$true] %s111_s28 }
  0x13   : > { %s122_s29 = sand.u32 1, %s577_s11   ;;  %p678_p7 = pnand %p412_p3, %p641_p5 }
  0x14   : > { %p400_p2 = pnand %p399_p1, %p61_p4  ;;  %s389_s3 = smul.u32 40, %s122_s29 }
  0x15   : > { %s383_s4 = sshll.u32 %s581_s12, 3  ;;  %s123_s17 = scalar_lea.sflag [#allocation6], %s122_s29 }
  0x16   : > { %402 = dma.hbm_to_vmem [thread:$0]  (!%p400_p2), %s110_s26, 64, %s112_s28, [#allocation3]  }
  0x17   : > { %s131_s7 = scalar_lea.hbm %s746_s1, %s383_s4  ;;  %s126_s8 = scalar_lea.vmem [#allocation5], %s389_s3 }
  0x18   : > { %s134_s14 = sshll.u32 %s126_s8, 4  ;;  %s132_s16 = sshll.u32 %s131_s7, 4  ;;  %s135_s14 = int_to_ptr.vmem [resolvable:$true] %s134_s14  ;;  %s133_s16 = int_to_ptr.hbm [resolvable:$true] %s132_s16 }
  0x19   : > { %s481_s24 = sshra.s32 %s133_s16, 4  ;;  %p485_p8 = pneg %p678_p7  ;;  %s482_s24 = int_to_ptr.hbm [resolvable:$true] %s481_s24 }
  0x1a   : > { %s483_s19 = scalar_lea.hbm %s482_s24, 40  ;;  %s488_s27 = scalar_lea.hbm %s746_s1, 80 }
  0x1b   : > { %p484_p5 = scmp.ne.s32.totalorder %s482_s24, %s483_s19  ;;  %p489_p1 = scmp.lt.s32.totalorder %s482_s24, %s746_s1 }
  0x1c   : > { %p490_p2 = scmp.lt.s32.totalorder %s488_s27, %s483_s19 }
  0x1d   : > { %p486_p9 = pnand %p485_p8, %p484_p5 }
  0x1e   : > { %p491_p3 = por %p490_p2, %p489_p1 }
  0x1f   : > { %p487_p10 = pneg %p486_p9 }
  0x21   : > { %p492_p0 = pnand %p491_p3, %p487_p10 }
  0x23   : > { %495 = shalt.err (!%p492_p0)
}
  0x24   : > { %s584_s29 = smov 256   ;;  %s585_s3 = smov 128  }
  0x25   : > { %s586_s5 = smov 8   ;;  %146 = sbr.rel (%p662_p13) target bundleno = 199 (0xc7), region = 28 }
  0x26   : > { %406 = dma.hbm_to_vmem [thread:$0]  (!%p678_p7), %s133_s16, 640, %s135_s14, %s123_s17, %s584_s29, %s585_s3, %s586_s5  }
  0x2a   : > { %556 = dma.done.wait (%p61_p4), [#allocation3], 64  }
  0x2b   : > { %558 = vsyncadd (%p61_p4), [#allocation3], 4294967232  ;;  %s703_s6 = sand.u32 1, %s573_s10  }
  0x2c   : > { %s390_s7 = smul.u32 40, %s703_s6  ;;  %s154_s8 = scalar_lea.sflag [#allocation6], %s703_s6 }
  0x2e   : > { %s157_s24 = scalar_lea.vmem [#allocation5], %s390_s7 }
  0x2f   : > { %560 = dma.done.wait (%p647_p6), %s154_s8, 640  }
  0x30   : > { %562 = vsyncadd (%p647_p6), %s154_s8, 4294966656  ;;  %v187_v0 = vld [vmem:[%s157_s24 + $0x20] sm:$0x33]  ;;  %vm217_vm0 = vcmask 1041408   ;;  %v370_v3 = vld [vmem:[%s157_s24 + $0x10] sm:$0xf] }
  0x31   : > { %v201_v1 = vunpack.c.l.b16 %v187_v0  ;;  %v202_v2 = vunpack.c.h.b16 %v187_v0  ;;  %v387_v6 = vld [vmem:[%s157_s24 + $0x14] sm:$0xf0]  ;;  %v386_v7 = vld [vmem:[%s157_s24 + $0x14] sm:$0xf]  ;;  %v372_v8 = vld [vmem:[%s157_s24 + $0x18] sm:$0xf0] }
  0x32   : > { %v371_v11 = vor.u32 %v387_v6, %v370_v3  ;;  %v375_v12 = vor.u32 %v386_v7, %v372_v8  ;;  %v362_v13 = vld [vmem:[%s157_s24] sm:$0xf]  ;;  %v385_v14 = vld [vmem:[%s157_s24 + $0x4] sm:$0xf0]  ;;  %v384_v15 = vld [vmem:[%s157_s24 + $0x4] sm:$0xf] }
  0x33   : > { %v207_v4 = vpack.c.b16 %v201_v1, %v201_v1  ;;  %v208_v5 = vpack.c.b16 %v202_v2, %v202_v2  ;;  %v364_v16 = vld [vmem:[%s157_s24 + $0x8] sm:$0xf0]  ;;  %v363_v17 = vor.u32 %v385_v14, %v362_v13  ;;  %v182_v19 = vld [vmem:[#allocation2] sm:$0xf]  ;;  %vm213_vm1 = vcmask 293888   ;;  %s388_s20 = sshll.u32 %s623_s13, 4 }
  0x34   : > { %v367_v18 = vor.u32 %v384_v15, %v364_v16  ;;  %s359_s23 = sshll.u32 %s703_s6, 4  ;;  %s264_s16 = scalar_lea.hbm %s747_s2, %s388_s20 }
  0x35   : > { %v219_v9 = vsel %vm217_vm0, %v207_v4, 0  ;;  %v222_v10 = vsel %vm217_vm0, %v208_v5, 0  ;;  %s178_s17 = scalar_lea.vmem [#allocation7], %s359_s23  ;;  %s268_s25 = sshll.u32 %s264_s16, 4  ;;  %s269_s25 = int_to_ptr.hbm [resolvable:$true] %s268_s25 }
  0x36   : > { %229 = vmatpush.bf16.msra.mxu0 %v219_v9  ;;  %242 = vmatpush.bf16.msra.mxu1 %v222_v10  ;;  %s266_s19 = sshll.u32 %s178_s17, 4  ;;  %s253_s26 = scalar_lea.sflag [#allocation4], %s703_s6  ;;  %s267_s19 = int_to_ptr.vmem [resolvable:$true] %s266_s19 }
  0x37   : > { %s525_s27 = sshra.s32 %s269_s25, 4  ;;  %s531_s29 = scalar_lea.hbm %s747_s2, 32  ;;  %s526_s27 = int_to_ptr.hbm [resolvable:$true] %s525_s27 }
  0x38   : > { %s527_s28 = scalar_lea.hbm %s526_s27, 16  ;;  %p532_p0 = scmp.lt.s32.totalorder %s526_s27, %s747_s2 }
  0x39   : > { %p528_p4 = scmp.ne.s32.totalorder %s526_s27, %s527_s28  ;;  %p533_p7 = scmp.lt.s32.totalorder %s531_s29, %s527_s28 }
  0x3a   : > { %230 = vmatpush.bf16.msra.mxu0 %v371_v11  ;;  %243 = vmatpush.bf16.msra.mxu1 %v375_v12 }
  0x3b   : > { %p529_p6 = pnand %p528_p4, %p654_p11  ;;  %p534_p5 = por %p533_p7, %p532_p0 }
  0x3d   : > { %p530_p13 = pneg %p529_p6 }
  0x3e   : > { %231 = vmatpush.bf16.msra.mxu0 %v363_v17  ;;  %244 = vmatpush.bf16.msra.mxu1 %v367_v18 }
  0x3f   : > { %p535_p8 = pnand %p534_p5, %p530_p13 }
  0x41   : > { %376 = vmatmul.msk.bf16.vlgmr.msra.gmra.mxu0 %vm213_vm1, %v182_v19  ;;  %377 = vmatmul.msk.bf16.vlgmr.msra.gmra.mxu1 %vm213_vm1, %v182_v19 }
  0xbe   : > { %v233_v20 = vpop.f32.mrf.mxu0  ;;  %v246_v21 = vpop.f32.mrf.mxu1 }
  0xbf   : > { %250 = vst [vmem:[%s178_s17] sm:$0xff] %v233_v20 }
  0xc0   : > { %251 = vst [vmem:[%s178_s17 + $0x8] sm:$0xff] %v246_v21 }
  0xc1   : > { %538 = shalt.err (!%p535_p8)
}
  0xc2   : > { %397 = dma.vmem_to_hbm [thread:$0]  (%p654_p11), %s267_s19, 256, %s269_s25, %s253_s26  }
  0xc6   : > { %v235_v22 = vpop.f32.mrf.mxu0  ;;  %v248_v23 = vpop.f32.mrf.mxu1 }
  0xc7 PF: > { %s280_s6 = sand.u32 1, %s569_s9   ;;  %p754_p9 = scmp.ge.s32.totalorder %s581_s12, 2 }
  0xc8   : > { %s281_s7 = scalar_lea.sflag [#allocation4], %s280_s6 }
  0xc9   : > { %p408_p10 = pnand %p754_p9, %p658_p12 }
  0xcb   : > { %p409_p1 = pneg %p408_p10 }
  0xcd   : > { %564 = dma.done.wait (%p409_p1), %s281_s7, 256  }
  0xce   : > { %566 = vsyncadd (%p409_p1), %s281_s7, 4294967040  ;;  %p16_p11 = scmp.ge.s32.totalorder %s627_s15, 4   ;;  %s755_s9 = smov %s573_s10 }
  0xcf   : > { %s756_s10 = smov %s577_s11  ;;  %s757_s11 = smov %s639_s18 }
  0xd0   : > { %s758_s12 = smov %s627_s15  ;;  %18 = sbr.rel (!%p16_p11) target bundleno = 6 (0x6), region = 78 }
  0xd5   :  { %287 = vsyncpa [#allocation3], 1 }
  0xd6   :  { %289 = vsyncpa [#allocation3 + $0x1], 1 }
  0xd7   :  { %290 = vsyncpa [#allocation6], 1 }
  0xd8   :  { %292 = vsyncpa [#allocation6 + $0x1], 1 }
  0xd9   :  { %293 = vsyncpa [#allocation4], 1 }
  0xda   :  { %295 = vsyncpa [#allocation4 + $0x1], 1 }

</bundles_post_ra>
